<compile_context>
chip_gen: v7x
topology: tpu7x:2x2x1
jax: 0.10.0
libtpu: 0.0.40
codegen_flags: <defaults>
</compile_context>

<pallas_src>
import functools

import jax
import jax.numpy as jnp
from jax import lax
from jax.experimental import pallas as pl
from jax.experimental.pallas import tpu as pltpu


def _attn_kernel(q_ref, k_ref, v_ref, wq_ref, bq_ref, wk_ref, bk_ref, seed_ref,
                 o_ref, *, B, Lq, Lk, dropout_p):
    # Fused Q/K projections across the whole batch (bf16 MXU, f32 accumulate).
    # The 1/inv_scale_factor is already folded into wq/bq on the host.
    q_all = jnp.dot(q_ref[...], wq_ref[...],
                    preferred_element_type=jnp.float32) + bq_ref[...]
    k_all = jnp.dot(k_ref[...], wk_ref[...],
                    preferred_element_type=jnp.float32) + bk_ref[...]
    qb = q_all.astype(jnp.bfloat16)
    kb = k_all.astype(jnp.bfloat16)

    if dropout_p > 0.0:
        pltpu.prng_seed(seed_ref[0])
        drop_scale = 1.0 / (1.0 - dropout_p)
        thr = jnp.uint32(min(int(dropout_p * 4294967296.0), 4294967295))

    # B is tiny (2): static unroll of the per-batch attention.
    for b in range(B):
        q_b = qb[b * Lq:(b + 1) * Lq, :]          # (Lq, DMp) bf16
        k_b = kb[b * Lk:(b + 1) * Lk, :]          # (Lk, DMp) bf16
        v_b = v_ref[b * Lk:(b + 1) * Lk, :]       # (Lk, DVp) bf16

        # scores = q_b @ k_b^T without materializing the transpose.
        s = lax.dot_general(q_b, k_b, (((1,), (1,)), ((), ())),
                            preferred_element_type=jnp.float32)

        # softmax along the key axis (f32 vector math).
        m = jnp.max(s, axis=-1, keepdims=True)
        e = jnp.exp(s - m)
        p = e * pl.reciprocal(jnp.sum(e, axis=-1, keepdims=True), approx=True)

        if dropout_p > 0.0:
            bits = pltpu.bitcast(pltpu.prng_random_bits(p.shape), jnp.uint32)
            p = p * (bits >= thr).astype(jnp.float32)

        o_b = jnp.dot(p.astype(jnp.bfloat16), v_b,
                      preferred_element_type=jnp.float32)
        if dropout_p > 0.0:
            o_b = o_b * drop_scale                # fold rescale into small output

        o_ref[b * Lq:(b + 1) * Lq, :] = o_b.astype(o_ref.dtype)


def model_forward(query, key, value, wq_t, bq, wk_t, bk, *,
                  inv_scale_factor, dropout_p=0.0, seed=0):
    B, Lq, Dq = query.shape
    _, Lk, Dk = key.shape
    _, _, Dv = value.shape
    Dm = wq_t.shape[1]

    LANE = 128
    DMp = max(LANE, ((Dm + LANE - 1) // LANE) * LANE)
    DVp = max(LANE, ((Dv + LANE - 1) // LANE) * LANE)

    inv = 1.0 / float(inv_scale_factor)
    # Fold the scale into the Q projection; zero-pad feature dims to 128 lanes.
    wq_p = jnp.zeros((Dq, DMp), jnp.float32).at[:, :Dm].set(wq_t * inv).astype(jnp.bfloat16)
    bq_p = jnp.zeros((1, DMp), jnp.float32).at[:, :Dm].set(bq * inv)
    wk_p = jnp.zeros((Dk, DMp), jnp.float32).at[:, :Dm].set(wk_t).astype(jnp.bfloat16)
    bk_p = jnp.zeros((1, DMp), jnp.float32).at[:, :Dm].set(bk)
    v_p = (jnp.zeros((B * Lk, DVp), jnp.float32)
           .at[:, :Dv].set(value.reshape(B * Lk, Dv)).astype(jnp.bfloat16))

    q_flat = query.reshape(B * Lq, Dq).astype(jnp.bfloat16)
    k_flat = key.reshape(B * Lk, Dk).astype(jnp.bfloat16)

    kernel = functools.partial(_attn_kernel, B=B, Lq=Lq, Lk=Lk,
                               dropout_p=float(dropout_p))

    vmem = pl.BlockSpec(memory_space=pltpu.MemorySpace.VMEM)
    out = pl.pallas_call(
        kernel,
        out_shape=jax.ShapeDtypeStruct((B * Lq, DVp), jnp.float32),
        in_specs=[vmem, vmem, vmem, vmem, vmem, vmem, vmem,
                  pl.BlockSpec(memory_space=pltpu.MemorySpace.SMEM)],
        out_specs=vmem,
    )(q_flat, k_flat, v_p, wq_p, bq_p, wk_p, bk_p,
      jnp.array([seed], jnp.int32))

    return out.reshape(B, Lq, DVp)[:, :, :Dv]


def _reference(query, key, value, wq_t, bq, wk_t, bk, inv_scale_factor):
    q = jnp.einsum("bld,dm->blm", query, wq_t) + bq
    k = jnp.einsum("bld,dm->blm", key, wk_t) + bk
    s = jnp.einsum("bqm,bkm->bqk", q, k) / inv_scale_factor
    p = jax.nn.softmax(s, axis=-1)
    return jnp.einsum("bqk,bkv->bqv", p, value)


if __name__ == "__main__":
    # Small shapes consistent with the module's forward (attention semantics):
    # the key sequence length must match the value sequence length.
    B, Lq, Lk = 2, 8, 8
    num_q, num_k, num_v = 32, 32, 32       # Linear in/out widths
    Dv = 32                                 # value feature dim
    dropout_p = 0.0                         # inference-mode dropout (identity)
    inv_scale_factor = float(num_v) ** 0.5

    key0 = jax.random.PRNGKey(0)
    k_q, k_k, k_v, k_wq, k_bq, k_wk, k_bk = jax.random.split(key0, 7)

    query1 = jax.random.normal(k_q, (B, Lq, num_q), dtype=jnp.float32)
    key1 = jax.random.normal(k_k, (B, Lk, num_k), dtype=jnp.float32)
    value1 = jax.random.normal(k_v, (B, Lk, Dv), dtype=jnp.float32)

    # Deterministic parameter init mimicking nn.Linear's U(-1/sqrt(in), 1/sqrt(in)).
    bq_bound = 1.0 / (num_q ** 0.5)
    bk_bound = 1.0 / (num_k ** 0.5)
    # PyTorch stores W as (out, in); we pre-transpose to (in, out).
    wq_t = jax.random.uniform(k_wq, (num_q, num_v), jnp.float32, -bq_bound, bq_bound)
    bq = jax.random.uniform(k_bq, (1, num_v), jnp.float32, -bq_bound, bq_bound)
    wk_t = jax.random.uniform(k_wk, (num_k, num_v), jnp.float32, -bk_bound, bk_bound)
    bk = jax.random.uniform(k_bk, (1, num_v), jnp.float32, -bk_bound, bk_bound)

    out = model_forward(query1, key1, value1, wq_t, bq, wk_t, bk,
                        inv_scale_factor=inv_scale_factor,
                        dropout_p=dropout_p, seed=0)
    out = jax.block_until_ready(out)

    ref = _reference(query1, key1, value1, wq_t, bq, wk_t, bk, inv_scale_factor)
    assert out.shape == (B, Lq, Dv)
    max_err = float(jnp.max(jnp.abs(out - ref)))
    # bf16 MXU inputs + approximate reciprocal -> relaxed (but tight for bf16) tolerance.
    assert jnp.allclose(out, ref, atol=2e-2, rtol=2e-2), \
        f"mismatch vs JAX reference (max abs err {max_err})"

    print("KERNEL_OK")
</pallas_src>

<mosaic_0001>
module attributes {stable_mosaic.version = 11 : i64} {
  func.func @_attn_kernel(%arg0: memref<16x32xbf16, #tpu.memory_space<vmem>>, %arg1: memref<16x32xbf16, #tpu.memory_space<vmem>>, %arg2: memref<16x128xbf16, #tpu.memory_space<vmem>>, %arg3: memref<32x128xbf16, #tpu.memory_space<vmem>>, %arg4: memref<1x128xf32, #tpu.memory_space<vmem>>, %arg5: memref<32x128xbf16, #tpu.memory_space<vmem>>, %arg6: memref<1x128xf32, #tpu.memory_space<vmem>>, %arg7: memref<1xi32, #tpu.memory_space<smem>>, %arg8: memref<16x128xf32, #tpu.memory_space<vmem>>) attributes {dimension_semantics = [], scalar_prefetch = 0 : i64, scratch_operands = 0 : i64, tpu.core_type = #tpu.core_type<tc>} {
    %c0 = arith.constant 0 : index
    %c0_0 = arith.constant 0 : index
    %0 = vector.load %arg0[%c0, %c0_0] : memref<16x32xbf16, #tpu.memory_space<vmem>>, vector<16x32xbf16>
    %c0_1 = arith.constant 0 : index
    %c0_2 = arith.constant 0 : index
    %1 = vector.load %arg3[%c0_1, %c0_2] : memref<32x128xbf16, #tpu.memory_space<vmem>>, vector<32x128xbf16>
    %cst = arith.constant dense<0.000000e+00> : vector<16x128xf32>
    %2 = tpu.matmul %0, %1, %cst {dimension_numbers = #tpu.dot_dimension_numbers<[1], [0], [0], [1], [0, 0, 1, 1], [], []>} : vector<16x32xbf16>, vector<32x128xbf16>, vector<16x128xf32> -> vector<16x128xf32>
    %c0_3 = arith.constant 0 : index
    %c0_4 = arith.constant 0 : index
    %3 = vector.load %arg4[%c0_3, %c0_4] : memref<1x128xf32, #tpu.memory_space<vmem>>, vector<1x128xf32>
    %4 = vector.broadcast %3 : vector<1x128xf32> to vector<16x128xf32>
    %5 = arith.addf %2, %4 : vector<16x128xf32>
    %c0_5 = arith.constant 0 : index
    %c0_6 = arith.constant 0 : index
    %6 = vector.load %arg1[%c0_5, %c0_6] : memref<16x32xbf16, #tpu.memory_space<vmem>>, vector<16x32xbf16>
    %c0_7 = arith.constant 0 : index
    %c0_8 = arith.constant 0 : index
    %7 = vector.load %arg5[%c0_7, %c0_8] : memref<32x128xbf16, #tpu.memory_space<vmem>>, vector<32x128xbf16>
    %cst_9 = arith.constant dense<0.000000e+00> : vector<16x128xf32>
    %8 = tpu.matmul %6, %7, %cst_9 {dimension_numbers = #tpu.dot_dimension_numbers<[1], [0], [0], [1], [0, 0, 1, 1], [], []>} : vector<16x32xbf16>, vector<32x128xbf16>, vector<16x128xf32> -> vector<16x128xf32>
    %c0_10 = arith.constant 0 : index
    %c0_11 = arith.constant 0 : index
    %9 = vector.load %arg6[%c0_10, %c0_11] : memref<1x128xf32, #tpu.memory_space<vmem>>, vector<1x128xf32>
    %10 = vector.broadcast %9 : vector<1x128xf32> to vector<16x128xf32>
    %11 = arith.addf %8, %10 : vector<16x128xf32>
    %12 = arith.truncf %5 : vector<16x128xf32> to vector<16x128xbf16>
    %13 = arith.truncf %11 : vector<16x128xf32> to vector<16x128xbf16>
    %14 = vector.extract_strided_slice %12 {offsets = [0, 0], sizes = [8, 128], strides = [1, 1]} : vector<16x128xbf16> to vector<8x128xbf16>
    %15 = vector.extract_strided_slice %13 {offsets = [0, 0], sizes = [8, 128], strides = [1, 1]} : vector<16x128xbf16> to vector<8x128xbf16>
    %c0_12 = arith.constant 0 : index
    %c0_13 = arith.constant 0 : index
    %16 = vector.load %arg2[%c0_12, %c0_13] : memref<16x128xbf16, #tpu.memory_space<vmem>>, vector<8x128xbf16>
    %cst_14 = arith.constant dense<0.000000e+00> : vector<8x8xf32>
    %17 = tpu.matmul %14, %15, %cst_14 {dimension_numbers = #tpu.dot_dimension_numbers<[1], [1], [0], [0], [0, 0, 1, 0], [], []>} : vector<8x128xbf16>, vector<8x128xbf16>, vector<8x8xf32> -> vector<8x8xf32>
    %cst_15 = arith.constant dense<0xFF800000> : vector<8xf32>
    %18 = vector.multi_reduction <maximumf>, %17, %cst_15 [1] : vector<8x8xf32> to vector<8xf32>
    %19 = vector.shape_cast %18 : vector<8xf32> to vector<8x1xf32>
    %20 = vector.broadcast %19 : vector<8x1xf32> to vector<8x8xf32>
    %21 = arith.subf %17, %20 : vector<8x8xf32>
    %22 = math.exp %21 : vector<8x8xf32>
    %cst_16 = arith.constant dense<0.000000e+00> : vector<8xf32>
    %23 = vector.multi_reduction <add>, %22, %cst_16 [1] : vector<8x8xf32> to vector<8xf32>
    %24 = vector.shape_cast %23 : vector<8xf32> to vector<8x1xf32>
    %25 = tpu.reciprocal %24 {approx = true} : vector<8x1xf32> -> vector<8x1xf32>
    %26 = vector.broadcast %25 : vector<8x1xf32> to vector<8x8xf32>
    %27 = arith.mulf %22, %26 : vector<8x8xf32>
    %28 = arith.truncf %27 : vector<8x8xf32> to vector<8x8xbf16>
    %cst_17 = arith.constant dense<0.000000e+00> : vector<8x128xf32>
    %29 = tpu.matmul %28, %16, %cst_17 {dimension_numbers = #tpu.dot_dimension_numbers<[1], [0], [0], [1], [0, 0, 1, 1], [], []>} : vector<8x8xbf16>, vector<8x128xbf16>, vector<8x128xf32> -> vector<8x128xf32>
    %c0_18 = arith.constant 0 : index
    %c0_19 = arith.constant 0 : index
    %30 = vector.load %arg8[%c0_18, %c0_19] : memref<16x128xf32, #tpu.memory_space<vmem>>, vector<8x128xf32>
    tpu.vector_store %arg8[%c0_18, %c0_19], %29 {strides = array<i32>} : memref<16x128xf32, #tpu.memory_space<vmem>>, vector<8x128xf32>,
    %31 = vector.extract_strided_slice %12 {offsets = [8, 0], sizes = [8, 128], strides = [1, 1]} : vector<16x128xbf16> to vector<8x128xbf16>
    %32 = vector.extract_strided_slice %13 {offsets = [8, 0], sizes = [8, 128], strides = [1, 1]} : vector<16x128xbf16> to vector<8x128xbf16>
    %c8 = arith.constant 8 : index
    %c0_20 = arith.constant 0 : index
    %33 = vector.load %arg2[%c8, %c0_20] : memref<16x128xbf16, #tpu.memory_space<vmem>>, vector<8x128xbf16>
    %cst_21 = arith.constant dense<0.000000e+00> : vector<8x8xf32>
    %34 = tpu.matmul %31, %32, %cst_21 {dimension_numbers = #tpu.dot_dimension_numbers<[1], [1], [0], [0], [0, 0, 1, 0], [], []>} : vector<8x128xbf16>, vector<8x128xbf16>, vector<8x8xf32> -> vector<8x8xf32>
    %cst_22 = arith.constant dense<0xFF800000> : vector<8xf32>
    %35 = vector.multi_reduction <maximumf>, %34, %cst_22 [1] : vector<8x8xf32> to vector<8xf32>
    %36 = vector.shape_cast %35 : vector<8xf32> to vector<8x1xf32>
    %37 = vector.broadcast %36 : vector<8x1xf32> to vector<8x8xf32>
    %38 = arith.subf %34, %37 : vector<8x8xf32>
    %39 = math.exp %38 : vector<8x8xf32>
    %cst_23 = arith.constant dense<0.000000e+00> : vector<8xf32>
    %40 = vector.multi_reduction <add>, %39, %cst_23 [1] : vector<8x8xf32> to vector<8xf32>
    %41 = vector.shape_cast %40 : vector<8xf32> to vector<8x1xf32>
    %42 = tpu.reciprocal %41 {approx = true} : vector<8x1xf32> -> vector<8x1xf32>
    %43 = vector.broadcast %42 : vector<8x1xf32> to vector<8x8xf32>
    %44 = arith.mulf %39, %43 : vector<8x8xf32>
    %45 = arith.truncf %44 : vector<8x8xf32> to vector<8x8xbf16>
    %cst_24 = arith.constant dense<0.000000e+00> : vector<8x128xf32>
    %46 = tpu.matmul %45, %33, %cst_24 {dimension_numbers = #tpu.dot_dimension_numbers<[1], [0], [0], [1], [0, 0, 1, 1], [], []>} : vector<8x8xbf16>, vector<8x128xbf16>, vector<8x128xf32> -> vector<8x128xf32>
    %c8_25 = arith.constant 8 : index
    %c0_26 = arith.constant 0 : index
    %47 = vector.load %arg8[%c8_25, %c0_26] : memref<16x128xf32, #tpu.memory_space<vmem>>, vector<8x128xf32>
    tpu.vector_store %arg8[%c8_25, %c0_26], %46 {strides = array<i32>} : memref<16x128xf32, #tpu.memory_space<vmem>>, vector<8x128xf32>,
    return
  }
}

</mosaic_0001>

<bundles_post_ra>
// kernel: tpu_custom_call.1
= control target key start
LH: loop header
LB: loop body
LE: loop exit
PB: predicated region body
PF: predicated region fallthrough
CT: control target
= control target key end

     0   :  { %14 = vsyncpa [#allocation4], 0  ;;  %s854_s0 = inlined_call_operand.hbm [shape: bf16[16,32], index: 0, kind: input, shape index: {}]   ;;  %s855_s1 = inlined_call_operand.hbm [shape: bf16[16,32], index: 1, kind: input, shape index: {}]   ;;  %s856_s2 = inlined_call_operand.hbm [shape: bf16[16,128], index: 2, kind: input, shape index: {}]   ;;  %s857_s3 = inlined_call_operand.hbm [shape: bf16[32,128], index: 3, kind: input, shape index: {}]   ;;  %s858_s4 = inlined_call_operand.vmem [shape: f32[1,128], index: 4, kind: input, shape index: {}]   ;;  %s859_s5 = inlined_call_operand.vmem [shape: bf16[32,128], index: 5, kind: input, shape index: {}]   ;;  %s860_s6 = inlined_call_operand.vmem [shape: f32[1,128], index: 6, kind: input, shape index: {}]   ;;  %s861_s7 = inlined_call_operand.<no memory space> [shape: s32[1], index: 7, kind: input, shape index: {}]   ;;  %s862_s8 = inlined_call_operand.hbm [shape: f32[16,128], index: 8, kind: output, shape index: {}]  }
   0x1   :  { %15 = vsyncpa [#allocation7], 0 }
   0x2   :  { %16 = vsyncpa [#allocation10], 0 }
   0x3   :  { %17 = vsyncpa [#allocation5], 0  ;;  %s674_s27 = smov [#allocation6]   ;;  %s675_s29 = smov [#allocation3]  }
   0x4   :  { %s35_s28 = sshll.u32 %s674_s27, 4  ;;  %s23_s30 = sshll.u32 %s675_s29, 4  ;;  %s36_s28 = int_to_ptr.vmem [resolvable:$true] %s35_s28  ;;  %s730_s30 = int_to_ptr.vmem [resolvable:$true] %s23_s30 }
   0x5   :  { %s556_s11 = scalar_lea.hbm %s855_s1, 128 }
   0x6   :  { %p557_p0 = scmp.ne.s32.totalorder %s855_s1, %s556_s11  ;;  %p560_p1 = scmp.lt.u32.totalorder %s556_s11, %s855_s1 }
   0x8   :  { %p562_p2 = pnand %p560_p1, %p557_p0 }
   0xa   :  { %565 = shalt.err (!%p562_p2)
}
   0xb   :  { %s566_s15 = scalar_lea.vmem %s36_s28, 128  ;;  %p571_p4 = scmp.lt.s32.totalorder %s36_s28, %s36_s28 }
   0xc   :  { %p567_p3 = scmp.ne.s32.totalorder %s36_s28, %s566_s15  ;;  %p572_p5 = scmp.lt.s32.totalorder %s566_s15, %s566_s15 }
   0xe   :  { %p573_p6 = por %p572_p5, %p571_p4 }
  0x10   :  { %p574_p7 = pnand %p573_p6, %p567_p3 }
  0x12   :  { %577 = shalt.err (!%p574_p7)
}
  0x13   :  { %s676_s16 = smov 64   ;;  %s677_s17 = smov 4  }
  0x14   :  { %41 = dma.hbm_to_vmem [thread:$0]  %s855_s1, 128, %s36_s28, [#allocation7], %s676_s16, %s676_s16, %s677_s17  }
  0x15   :  { %s578_s22 = scalar_lea.hbm %s854_s0, 128 }
  0x16   :  { %p579_p8 = scmp.ne.s32.totalorder %s854_s0, %s578_s22  ;;  %p582_p9 = scmp.lt.u32.totalorder %s578_s22, %s854_s0 }
  0x18   :  { %p584_p10 = pnand %p582_p9, %p579_p8 }
  0x1a   :  { %587 = shalt.err (!%p584_p10)
}
  0x1b   :  { %s588_s27 = scalar_lea.vmem %s730_s30, 128  ;;  %p593_p12 = scmp.lt.s32.totalorder %s730_s30, %s730_s30 }
  0x1c   :  { %p589_p11 = scmp.ne.s32.totalorder %s730_s30, %s588_s27  ;;  %p594_p13 = scmp.lt.s32.totalorder %s588_s27, %s588_s27 }
  0x1e   :  { %p595_p0 = por %p594_p13, %p593_p12 }
  0x20   :  { %p596_p1 = pnand %p595_p0, %p589_p11 }
  0x22   :  { %599 = shalt.err (!%p596_p1)
}
  0x23   :  { %29 = dma.hbm_to_vmem [thread:$0]  %s854_s0, 128, %s730_s30, [#allocation4], %s676_s16, %s676_s16, %s677_s17  }
  0x24   :  { %s678_s29 = smov [#allocation8]   ;;  %s679_s10 = smov [#allocation9]  }
  0x25   :  { %s47_s9 = sshll.u32 %s678_s29, 4  ;;  %s59_s11 = sshll.u32 %s679_s10, 4  ;;  %s48_s9 = int_to_ptr.vmem [resolvable:$true] %s47_s9  ;;  %s767_s11 = int_to_ptr.vmem [resolvable:$true] %s59_s11 }
  0x26   :  { %s600_s13 = scalar_lea.hbm %s856_s2, 128 }
  0x27   :  { %p601_p2 = scmp.ne.s32.totalorder %s856_s2, %s600_s13  ;;  %p604_p3 = scmp.lt.u32.totalorder %s600_s13, %s856_s2 }
  0x29   :  { %p606_p4 = pnand %p604_p3, %p601_p2 }
  0x2b   :  { %609 = shalt.err (!%p606_p4)
}
  0x2c   :  { %s610_s0 = scalar_lea.vmem %s48_s9, 128  ;;  %p615_p6 = scmp.lt.s32.totalorder %s48_s9, %s48_s9 }
  0x2d   :  { %p611_p5 = scmp.ne.s32.totalorder %s48_s9, %s610_s0  ;;  %p616_p7 = scmp.lt.s32.totalorder %s610_s0, %s610_s0 }
  0x2f   :  { %p617_p8 = por %p616_p7, %p615_p6 }
  0x31   :  { %p618_p9 = pnand %p617_p8, %p611_p5 }
  0x33   :  { %621 = shalt.err (!%p618_p9)
}
  0x34   :  { %53 = dma.hbm_to_vmem [thread:$0]  %s856_s2, 128, %s48_s9, [#allocation7], %s676_s16, %s676_s16, %s677_s17  }
  0x35   :  { %s622_s23 = scalar_lea.hbm %s857_s3, 256 }
  0x36   :  { %p623_p10 = scmp.ne.s32.totalorder %s857_s3, %s622_s23  ;;  %p626_p11 = scmp.lt.u32.totalorder %s622_s23, %s857_s3 }
  0x38   :  { %p628_p12 = pnand %p626_p11, %p623_p10 }
  0x3a   :  { %631 = shalt.err (!%p628_p12)
}
  0x3b   :  { %s632_s1 = scalar_lea.vmem %s767_s11, 256  ;;  %p637_p0 = scmp.lt.s32.totalorder %s767_s11, %s767_s11 }
  0x3c   :  { %p633_p13 = scmp.ne.s32.totalorder %s767_s11, %s632_s1  ;;  %p638_p1 = scmp.lt.s32.totalorder %s632_s1, %s632_s1 }
  0x3e   :  { %p639_p2 = por %p638_p1, %p637_p0 }
  0x40   :  { %p640_p3 = pnand %p639_p2, %p633_p13 }
  0x42   :  { %643 = shalt.err (!%p640_p3)
}
  0x43   :  { %65 = dma.hbm_to_vmem [thread:$0]  %s857_s3, 256, %s767_s11, [#allocation10], %s676_s16, %s676_s16, %s677_s17  }
  0x44   :  { %666 = dma.done.wait [#allocation4], 128  }
  0x45   :  { %667 = vsyncadd [#allocation4], 4294967168 }
  0x46   :  { %668 = dma.done.wait [#allocation7], 256  }
  0x47   :  { %669 = vsyncadd [#allocation7], 4294967040 }
  0x48   :  { %670 = dma.done.wait [#allocation10], 256  }
  0x49   :  { %671 = vsyncadd [#allocation10], 4294967040  ;;  %v680_v0 = vmov 0.0   ;;  %vm681_vm0 = vmmov 0   ;;  %v542_v1 = vld [vmem:[%s859_s5] sm:$0xff]   ;;  %v543_v2 = vld [vmem:[%s859_s5 + $0x8] sm:$0xff]  }
  0x4a   :  { %499 = vmatprep.subr.bf16.mxu1 %v680_v0  ;;  %491 = vmatprep.subr.bf16.mxu0 %v680_v0  ;;  %v544_v3 = vld [vmem:[#allocation9] sm:$0xff]   ;;  %v546_v4 = vld [vmem:[#allocation9 + $0x8] sm:$0xff]   ;;  %v545_v5 = vld [vmem:[#allocation6] sm:$0xff]   ;;  %vm117_vm1 = vcmask 261120   ;;  %vm279_vm2 = vcmask 64512   ;;  %vm295_vm3 = vcmask 1043456  }
  0x4b   :  { %503 = vmatprep.mubr.msk.bf16.mxu1 %vm681_vm0, %v680_v0  ;;  %495 = vmatprep.mubr.msk.bf16.mxu0 %vm681_vm0, %v680_v0  ;;  %v547_v6 = vld [vmem:[#allocation3] sm:$0xff]   ;;  %v238_v45 = vld [vmem:[#allocation8] sm:$0xf]  ;;  %v340_v50 = vld [vmem:[#allocation8 + $0x4] sm:$0xf] }
  0x4c   :  { %500 = vmatpush3.bf16.msra.mxu1 %v542_v1  ;;  %492 = vmatpush3.bf16.msra.mxu0 %v544_v3  ;;  %v470_v7 = vld [vmem:[%s860_s6] ss:$0 sm:$0xff]  ;;  %v297_v46 = vsel %vm295_vm3, %v238_v45, 0  ;;  %v403_v53 = vsel %vm295_vm3, %v340_v50, 0 }
  0x4d   :  { %501 = vmatprep.subr.bf16.mxu1 %v680_v0  ;;  %493 = vmatprep.subr.bf16.mxu0 %v680_v0  ;;  %v465_v9 = vld [vmem:[%s858_s4] ss:$0 sm:$0xff]  ;;  %s682_s4 = smov [#allocation11]  }
  0x4e   :  { %s451_s6 = sshll.u32 %s682_s4, 4  ;;  %s452_s6 = int_to_ptr.vmem [resolvable:$true] %s451_s6 }
  0x4f   :  { %s644_s12 = scalar_lea.vmem %s452_s6, 256  ;;  %p649_p5 = scmp.lt.s32.totalorder %s452_s6, %s452_s6 }
  0x50   :  { %502 = vmatpush3.bf16.msra.mxu1 %v543_v2  ;;  %494 = vmatpush3.bf16.msra.mxu0 %v546_v4  ;;  %p645_p4 = scmp.ne.s32.totalorder %s452_s6, %s644_s12  ;;  %p650_p6 = scmp.lt.s32.totalorder %s644_s12, %s644_s12 }
  0x51   :  { %513 = vmatprep.subr.bf16.mxu1 %v680_v0  ;;  %507 = vmatprep.subr.bf16.mxu0 %v680_v0 }
  0x52   :  { %p651_p7 = por %p650_p6, %p649_p5 }
  0x53   :  { %504 = vmatmul.mubr.msk.bf16.vlgmr.msra.gmra.mrb[0].mxu1 %vm117_vm1, %v545_v5  ;;  %496 = vmatmul.mubr.msk.bf16.vlgmr.msra.gmra.mrb[0].mxu0 %vm117_vm1, %v547_v6 }
  0x54   :  { %515 = vmatprep.mubr.msk.bf16.mxu1 %vm681_vm0, %v680_v0  ;;  %509 = vmatprep.mubr.msk.bf16.mxu0 %vm681_vm0, %v680_v0  ;;  %p652_p8 = pnand %p651_p7, %p645_p4 }
  0x55   :  { %514 = vmatpush3.bf16.msra.mxu1 %v297_v46 }
  0x56   :  { %525 = vmatprep.subr.bf16.mxu1 %v680_v0 }
 0x126   :  { %v229_v8 = vpop.f32.mrb[0].mxu1  ;;  %v155_v12 = vpop.f32.mrb[0].mxu0 }
 0x127   :  { %v505_v10 = vpop.f32.mrb[1].mxu1  ;;  %v230_v13 = vadd.f32 %v470_v7, %v229_v8  ;;  %v156_v16 = vadd.f32 %v465_v9, %v155_v12  ;;  %v497_v17 = vpop.f32.mrb[1].mxu0 }
 0x128   :  { %v232_v11 = vpop.f32.mrb[2].mxu1  ;;  %v158_v18 = vpop.f32.mrb[2].mxu0 }
 0x129   :  { %v233_v14 = vadd.f32 %v470_v7, %v232_v11  ;;  %v506_v15 = vpop.f32.mrb[3].mxu1  ;;  %v159_v20 = vadd.f32 %v465_v9, %v158_v18  ;;  %v498_v21 = vpop.f32.mrb[3].mxu0 }
 0x12b   :  { %v237_v19 = vpack.c.bf16 %v233_v14, %v230_v13  ;;  %v236_v22 = vpack.c.bf16 %v159_v20, %v156_v16 }
 0x12d   :  { %508 = vmatpush3.bf16.xpose.msra.mxu0 %v237_v19  ;;  %v345_v23 = vrot.slane %v237_v19, 4  ;;  %v342_v24 = vrot.slane %v236_v22, 4 }
 0x12e   :  { %519 = vmatprep.subr.bf16.mxu0 %v680_v0 }
 0x134   :  { %510 = vmatmul.mubr.bf16.vlgmr.msra.gmra.mrb[4].mxu0 %v236_v22 }
 0x135   :  { %520 = vmatpush3.bf16.xpose.msra.mxu0 %v345_v23  ;;  %521 = vmatprep.mubr.msk.bf16.mxu0 %vm681_vm0, %v680_v0 }
 0x13c   :  { %522 = vmatmul.mubr.bf16.vlgmr.msra.gmra.mrb[8].mxu0 %v342_v24 }
 0x207   :  { %v273_v25 = vpop.f32.mrb[4].mxu0 }
 0x208   :  { %v511_v26 = vpop.f32.mrb[5].mxu0  ;;  %v280_v27 = vsel %vm279_vm2, %v273_v25, -inf }
 0x209   :  { %281 = vmax.xlane.f32.xlu0 %v280_v27  ;;  %v276_v28 = vpop.f32.mrb[6].mxu0 }
 0x20a   :  { %v512_v29 = vpop.f32.mrb[7].mxu0 }
 0x20f   :  { %v381_v30 = vpop.f32.mrb[8].mxu0 }
 0x210   :  { %v523_v31 = vpop.f32.mrb[9].mxu0  ;;  %v387_v32 = vsel %vm279_vm2, %v381_v30, -inf }
 0x211   :  { %388 = vmax.xlane.f32.xlu0 %v387_v32  ;;  %v384_v33 = vpop.f32.mrb[10].mxu0 }
 0x212   :  { %v524_v34 = vpop.f32.mrb[11].mxu0 }
 0x296   :  { %v282_v35 = vpop.xlane.xlu0 %281 }
 0x297   :  { %v283_v36 = vsub.f32 %v273_v25, %v282_v35 }
 0x299   :  { %v284_v37 = vmul.f32 1.442695, %v283_v36 }
 0x29b   :  { %548 = vpow2.f32 %v284_v37 }
 0x29e   :  { %v389_v38 = vpop.xlane.xlu0 %388 }
 0x29f   :  { %v390_v39 = vsub.f32 %v381_v30, %v389_v38 }
 0x2a1   :  { %v391_v40 = vmul.f32 1.442695, %v390_v39 }
 0x2a3   :  { %550 = vpow2.f32 %v391_v40 }
 0x2a5   :  { %v549_v41 = vpop.eup %548 }
 0x2a6   :  { %v286_v42 = vsel %vm279_vm2, %v549_v41, 0.0 }
 0x2a7   :  { %287 = vadd.xlane.f32.xlu1 %v286_v42 }
 0x2ad   :  { %v551_v43 = vpop.eup %550 }
 0x2ae   :  { %v393_v44 = vsel %vm279_vm2, %v551_v43, 0.0 }
 0x2af   :  { %394 = vadd.xlane.f32.xlu1 %v393_v44 }
 0x334   :  { %v288_v47 = vpop.xlane.xlu1 %287 }
 0x335   :  { %552 = vrcp.f32 %v288_v47 }
 0x33c   :  { %v395_v48 = vpop.xlane.xlu1 %394 }
 0x33d   :  { %554 = vrcp.f32 %v395_v48 }
 0x33f   :  { %v553_v49 = vpop.eup %552 }
 0x340   :  { %v290_v51 = vmul.f32 %v553_v49, %v549_v41 }
 0x342   :  { %v291_v52 = vpack.c.bf16 %v290_v51, %v290_v51 }
 0x344   :  { %516 = vmatmul.mubr.msk.bf16.vlgmr.msra.gmra.mrb[4].mxu1 %vm279_vm2, %v291_v52 }
 0x345   :  { %526 = vmatpush3.bf16.msra.mxu1 %v403_v53  ;;  %527 = vmatprep.mubr.msk.bf16.mxu1 %vm681_vm0, %v680_v0 }
 0x347   :  { %v555_v54 = vpop.eup %554 }
 0x348   :  { %v397_v55 = vmul.f32 %v555_v54, %v551_v43 }
 0x34a   :  { %v398_v56 = vpack.c.bf16 %v397_v55, %v397_v55 }
 0x34c   :  { %528 = vmatmul.mubr.msk.bf16.vlgmr.msra.gmra.mrb[8].mxu1 %vm279_vm2, %v398_v56 }
 0x417   :  { %v333_v57 = vpop.f32.mrb[4].mxu1 }
 0x418   :  { %339 = vst [vmem:[#allocation11] sm:$0xff] %v333_v57  ;;  %v517_v58 = vpop.f32.mrb[5].mxu1 }
 0x419   :  { %v336_v59 = vpop.f32.mrb[6].mxu1 }
 0x41a   :  { %v518_v60 = vpop.f32.mrb[7].mxu1 }
 0x41f   :  { %v439_v61 = vpop.f32.mrb[8].mxu1 }
 0x420   :  { %445 = vst [vmem:[#allocation11 + $0x8] sm:$0xff] %v439_v61  ;;  %v529_v62 = vpop.f32.mrb[9].mxu1 }
 0x421   :  { %v442_v63 = vpop.f32.mrb[10].mxu1 }
 0x422   :  { %655 = shalt.err (!%p652_p8)
}
 0x423   :  { %s656_s14 = scalar_lea.hbm %s862_s8, 256 }
 0x424   :  { %p657_p9 = scmp.ne.s32.totalorder %s862_s8, %s656_s14  ;;  %p660_p10 = scmp.lt.u32.totalorder %s656_s14, %s862_s8 }
 0x426   :  { %p662_p11 = pnand %p660_p10, %p657_p9 }
 0x428   :  { %665 = shalt.err (!%p662_p11)
}
 0x429   :  { %s683_s30 = smov 128   ;;  %s684_s20 = smov 8   ;;  %v530_v0 = vpop.f32.mrb[11].mxu1 }
 0x42a   :  { %457 = dma.vmem_to_hbm [thread:$0]  %s452_s6, 256, %s862_s8, [#allocation5], %s683_s30, %s683_s30, %s684_s20  }
 0x42b   :  { %672 = dma.done.wait [#allocation5], 256  }
 0x42c   :  { %673 = vsyncadd [#allocation5], 4294967040 }
 0x42d   :  { %461 = vsyncpa [#allocation4], 1 }
 0x42e   :  { %462 = vsyncpa [#allocation7], 1 }
 0x42f   :  { %463 = vsyncpa [#allocation10], 1 }
 0x430   :  { %464 = vsyncpa [#allocation5], 1 }

</bundles_post_ra>
